<compile_context>
chip_gen: v7x
topology: tpu7x:2x2x1
jax: 0.10.0
libtpu: 0.0.40
codegen_flags: <defaults>
</compile_context>

<pallas_src>
import jax
import jax.numpy as jnp
from jax.experimental import pallas as pl
from jax.experimental.pallas import tpu as pltpu


def _round_up(x, m):
    return (x + m - 1) // m * m


def _complex_to_real_op(M):
    """(N,N) complex operator -> (2N,2N) real operator acting (by right
    multiplication) on interleaved row vectors [re0, im0, re1, im1, ...]."""
    n = M.shape[0]
    c = jnp.real(M).astype(jnp.float32)
    s = jnp.imag(M).astype(jnp.float32)
    R = jnp.zeros((2 * n, 2 * n), jnp.float32)
    R = R.at[0::2, 0::2].set(c)
    R = R.at[1::2, 0::2].set(-s)
    R = R.at[0::2, 1::2].set(s)
    R = R.at[1::2, 1::2].set(c)
    return R


def make_dft_mats(N):
    n = jnp.arange(N)
    ang = 2.0 * jnp.pi * jnp.outer(n, n) / N
    F = jnp.exp(-1j * ang)          # torch.fft  (unnormalized forward DFT)
    Finv = jnp.exp(1j * ang) / N    # torch.ifft (1/N normalized inverse DFT)
    return _complex_to_real_op(Finv), _complex_to_real_op(F)


def autoencoder_kernel(sigma_ref,
                       x_ref, noise_ref,
                       w1e_ref, b1e_ref, w2e_ref, b2e_ref,
                       w1d_ref, b1d_ref, w2d_ref, b2d_ref,
                       dec_ref, out_ref):
    sigma = sigma_ref[0, 0]                              # SMEM scalar
    x = x_ref[...]                                       # (DP, TB) bf16, feature-major

    # --- encoder L1: relu(W1e^T @ X + b1e^T) ---
    h1 = jnp.maximum(
        jnp.dot(w1e_ref[...], x, preferred_element_type=jnp.float32)
        + b1e_ref[...], 0.0)                             # (HP, TB) f32

    # --- encoder L2 with the IDFT folded into the weights:
    #     OUT == torch.ifft(encode, 1) on the interleaved view ---
    out = (jnp.dot(w2e_ref[...], h1.astype(jnp.bfloat16),
                   preferred_element_type=jnp.float32) + b2e_ref[...])  # (DP, TB)

    # --- x = util.channel(out, snr, N) + out  (AWGN model) ---
    xc = out + sigma * noise_ref[...].astype(jnp.float32)

    # --- decoder L1 with the DFT folded into the weights:
    #     H2 == relu(W1d^T @ torch.fft(xc, 1) + b1d^T) ---
    h2 = jnp.maximum(
        jnp.dot(w1d_ref[...], xc.astype(jnp.bfloat16),
                preferred_element_type=jnp.float32) + b1d_ref[...], 0.0)

    # --- decoder L2 ---
    dec = (jnp.dot(w2d_ref[...], h2.astype(jnp.bfloat16),
                   preferred_element_type=jnp.float32) + b2d_ref[...])

    out_ref[...] = out.astype(out_ref.dtype)             # bf16, lane-dense store
    dec_ref[...] = dec.astype(dec_ref.dtype)


def autoencoder_forward(x, noise, params, N, snr, tile_b=None):
    B = x.shape[0]
    D = 2 * N
    w1e, b1e, w2e, b2e, w1d, b1d, w2d, b2d = params
    H = w1e.shape[1]

    # ---- host-side folding of the IDFT / DFT operators (in f32) ----
    idft_r, dft_r = make_dft_mats(N)
    w2e_f = w2e.astype(jnp.float32) @ idft_r          # (H, D)  encoder L2 + ifft
    b2e_f = b2e.astype(jnp.float32) @ idft_r          # (1, D)
    w1d_f = dft_r @ w1d.astype(jnp.float32)           # (D, H)  fft + decoder L1

    # ---- feature-major padded sizes: features -> sublanes, batch -> lanes ----
    DP = _round_up(D, 16)          # bf16 sublane packing granularity
    HP = _round_up(H, 16)
    BP = _round_up(B, 128)         # lane granularity

    if tile_b is None:
        # One big block amortizes the ~0.35us/step overhead on single-TC
        # chips (v5e/v6e); cap for very large batches so v7x's two
        # TensorCores both get work and tiles stay comfortably in VMEM.
        tile_b = BP if BP <= 1024 else 512
    tile_b = max(128, _round_up(min(tile_b, BP), 128))
    BP = _round_up(BP, tile_b)                         # no partial batch blocks
    gsteps = BP // tile_b

    def pad_to(a, rows, cols, dtype):
        r, c = a.shape
        if (r, c) != (rows, cols):
            a = jnp.pad(a, ((0, rows - r), (0, cols - c)))
        return a.astype(dtype)

    # activations (feature, batch): single cast+pad pass, no 128-lane padding
    x_t = pad_to(x.reshape(B, D).T, DP, BP, jnp.bfloat16)
    n_t = pad_to(noise.reshape(B, D).T, DP, BP, jnp.bfloat16)

    # weights pre-transposed for feature-major (W^T @ X) matmuls
    w1e_t = pad_to(w1e.T, HP, DP, jnp.bfloat16)
    w2e_t = pad_to(w2e_f.T, DP, HP, jnp.bfloat16)
    w1d_t = pad_to(w1d_f.T, HP, DP, jnp.bfloat16)
    w2d_t = pad_to(w2d.T, DP, HP, jnp.bfloat16)
    b1e_t = pad_to(b1e.T, HP, 1, jnp.float32)
    b2e_t = pad_to(b2e_f.T, DP, 1, jnp.float32)
    b1d_t = pad_to(b1d.T, HP, 1, jnp.float32)
    b2d_t = pad_to(b2d.T, DP, 1, jnp.float32)

    # sigma as an SMEM scalar (no host sync, no per-snr recompile)
    sigma = jnp.sqrt(10.0 ** (-snr / 10.0) / 2.0).astype(jnp.float32).reshape(1, 1)

    col_spec = pl.BlockSpec((DP, tile_b), lambda i: (0, i))

    # Grid-invariant weights/biases: single-buffer them when the grid actually
    # pipelines (>1 step) so they are resident once instead of twice in VMEM.
    if gsteps > 1:
        def const_spec(shape):
            return pl.BlockSpec(shape, lambda i: (0, 0),
                                pipeline_mode=pl.Buffered(1))
    else:
        def const_spec(shape):
            return pl.BlockSpec(shape, lambda i: (0, 0))

    # ---- advisory cost estimate & VMEM budget derived from actual footprint ----
    flops = int(8 * DP * HP * BP)                         # 4 MXU matmuls
    bytes_accessed = int(4 * DP * BP * 2                  # x, noise, dec, out (bf16)
                         + 4 * DP * HP * 2                # weights (bf16)
                         + 2 * (DP + HP) * 4)             # biases (f32)

    act_tile = DP * tile_b
    footprint = (4 * 2 * act_tile * 2                     # x,noise,dec,out tiles, <=2 bufs, bf16
                 + 2 * (4 * DP * HP * 2 + 2 * (DP + HP) * 4)   # weights/biases (<=2 bufs)
                 + 6 * max(DP, HP) * tile_b * 4)          # f32 intermediates
    vmem_limit = int(min(max(2 * footprint, 16 << 20), 64 << 20))  # cap for v7x (64 MiB/TC)

    dec_t, out_t = pl.pallas_call(
        autoencoder_kernel,
        out_shape=(jax.ShapeDtypeStruct((DP, BP), jnp.bfloat16),
                   jax.ShapeDtypeStruct((DP, BP), jnp.bfloat16)),
        grid=(gsteps,),
        in_specs=[pl.BlockSpec(memory_space=pltpu.MemorySpace.SMEM),   # sigma
                  col_spec, col_spec,                                  # x, noise
                  const_spec((HP, DP)), const_spec((HP, 1)),           # encoder L1
                  const_spec((DP, HP)), const_spec((DP, 1)),           # encoder L2 (+ifft)
                  const_spec((HP, DP)), const_spec((HP, 1)),           # decoder L1 (+fft)
                  const_spec((DP, HP)), const_spec((DP, 1))],          # decoder L2
        out_specs=(col_spec, col_spec),
        compiler_params=pltpu.CompilerParams(
            dimension_semantics=("parallel",),
            vmem_limit_bytes=vmem_limit),
        cost_estimate=pl.CostEstimate(flops=flops, transcendentals=0,
                                      bytes_accessed=bytes_accessed),
    )(sigma, x_t, n_t,
      w1e_t, b1e_t, w2e_t, b2e_t, w1d_t, b1d_t, w2d_t, b2d_t)

    dec = dec_t[:D, :B].astype(jnp.float32).T.reshape(B, N, 2)
    out = out_t[:D, :B].astype(jnp.float32).T.reshape(B, N, 2)
    return dec, out


def reference_forward(x, noise, params, N, snr):
    """Pure-JAX f32 reference mirroring the PyTorch forward (with jnp.fft)."""
    B = x.shape[0]
    D = 2 * N
    w1e, b1e, w2e, b2e, w1d, b1d, w2d, b2d = params
    sigma = jnp.sqrt(10.0 ** (-snr / 10.0) / 2.0)

    x2 = x.reshape(B, D)
    h1 = jnp.maximum(x2 @ w1e + b1e, 0.0)
    enc = (h1 @ w2e + b2e).reshape(B, N, 2)

    z = enc[..., 0] + 1j * enc[..., 1]
    out_c = jnp.fft.ifft(z, axis=-1)
    out = jnp.stack([jnp.real(out_c), jnp.imag(out_c)], axis=-1)

    xc = out + sigma * noise
    xc_c = xc[..., 0] + 1j * xc[..., 1]
    y_c = jnp.fft.fft(xc_c, axis=-1)
    y = jnp.stack([jnp.real(y_c), jnp.imag(y_c)], axis=-1).reshape(B, D)

    h2 = jnp.maximum(y @ w1d + b1d, 0.0)
    dec = (h2 @ w2d + b2d).reshape(B, N, 2)
    return dec, out


if __name__ == "__main__":
    B, N, H = 256, 8, 32        # batch, FFT length (complex), hidden width
    snr = 10.0                  # dB
    D = 2 * N

    key = jax.random.PRNGKey(0)
    ks = jax.random.split(key, 10)
    x = jax.random.normal(ks[0], (B, N, 2), jnp.float32)
    noise = jax.random.normal(ks[1], (B, N, 2), jnp.float32)

    def init(k, shape, scale):
        return (scale * jax.random.normal(k, shape)).astype(jnp.float32)

    params = (
        init(ks[2], (D, H), 0.1), init(ks[3], (1, H), 0.01),   # encoder L1
        init(ks[4], (H, D), 0.1), init(ks[5], (1, D), 0.01),   # encoder L2
        init(ks[6], (D, H), 0.1), init(ks[7], (1, H), 0.01),   # decoder L1
        init(ks[8], (H, D), 0.1), init(ks[9], (1, D), 0.01),   # decoder L2
    )

    dec, out = autoencoder_forward(x, noise, params, N, snr)
    jax.block_until_ready((dec, out))

    dec_ref, out_ref = reference_forward(x, noise, params, N, snr)
    assert dec.shape == (B, N, 2) and out.shape == (B, N, 2)
    assert jnp.allclose(dec, dec_ref, atol=3e-2, rtol=3e-2), \
        float(jnp.max(jnp.abs(dec - dec_ref)))
    assert jnp.allclose(out, out_ref, atol=3e-2, rtol=3e-2), \
        float(jnp.max(jnp.abs(out - out_ref)))

    print("KERNEL_OK")
</pallas_src>

<mosaic_0001>
module attributes {stable_mosaic.version = 11 : i64} {
  func.func @autoencoder_kernel(%arg0: i32, %arg1: memref<1x1xf32, #tpu.memory_space<smem>>, %arg2: memref<16x256xbf16, #tpu.memory_space<vmem>>, %arg3: memref<16x256xbf16, #tpu.memory_space<vmem>>, %arg4: memref<32x16xbf16, #tpu.memory_space<vmem>>, %arg5: memref<32x1xf32, #tpu.memory_space<vmem>>, %arg6: memref<16x32xbf16, #tpu.memory_space<vmem>>, %arg7: memref<16x1xf32, #tpu.memory_space<vmem>>, %arg8: memref<32x16xbf16, #tpu.memory_space<vmem>>, %arg9: memref<32x1xf32, #tpu.memory_space<vmem>>, %arg10: memref<16x32xbf16, #tpu.memory_space<vmem>>, %arg11: memref<16x1xf32, #tpu.memory_space<vmem>>, %arg12: memref<16x256xbf16, #tpu.memory_space<vmem>>, %arg13: memref<16x256xbf16, #tpu.memory_space<vmem>>) attributes {dimension_semantics = [#tpu.dimension_semantics<parallel>], iteration_bounds = array<i64: 1>, scalar_prefetch = 0 : i64, scratch_operands = 0 : i64, tpu.core_type = #tpu.core_type<tc>, window_params = [{transform_indices = @transform_0, window_bounds = array<i64: 1, 1>}, {transform_indices = @transform_1, window_bounds = array<i64: 16, 256>}, {transform_indices = @transform_2, window_bounds = array<i64: 16, 256>}, {pipeline_mode = #tpu.pipeline_mode<synchronous>, transform_indices = @transform_3, window_bounds = array<i64: 32, 16>}, {pipeline_mode = #tpu.pipeline_mode<synchronous>, transform_indices = @transform_4, window_bounds = array<i64: 32, 1>}, {pipeline_mode = #tpu.pipeline_mode<synchronous>, transform_indices = @transform_5, window_bounds = array<i64: 16, 32>}, {pipeline_mode = #tpu.pipeline_mode<synchronous>, transform_indices = @transform_6, window_bounds = array<i64: 16, 1>}, {pipeline_mode = #tpu.pipeline_mode<synchronous>, transform_indices = @transform_7, window_bounds = array<i64: 32, 16>}, {pipeline_mode = #tpu.pipeline_mode<synchronous>, transform_indices = @transform_8, window_bounds = array<i64: 32, 1>}, {pipeline_mode = #tpu.pipeline_mode<synchronous>, transform_indices = @transform_9, window_bounds = array<i64: 16, 32>}, {pipeline_mode = #tpu.pipeline_mode<synchronous>, transform_indices = @transform_10, window_bounds = array<i64: 16, 1>}, {transform_indices = @transform_11, window_bounds = array<i64: 16, 256>}, {transform_indices = @transform_12, window_bounds = array<i64: 16, 256>}]} {
    %c0 = arith.constant 0 : index
    %c0_0 = arith.constant 0 : index
    %0 = memref.load %arg1[%c0, %c0_0] : memref<1x1xf32, #tpu.memory_space<smem>>
    %c0_1 = arith.constant 0 : index
    %c0_2 = arith.constant 0 : index
    %1 = vector.load %arg2[%c0_1, %c0_2] : memref<16x256xbf16, #tpu.memory_space<vmem>>, vector<16x256xbf16>
    %c0_3 = arith.constant 0 : index
    %c0_4 = arith.constant 0 : index
    %2 = vector.load %arg4[%c0_3, %c0_4] : memref<32x16xbf16, #tpu.memory_space<vmem>>, vector<32x16xbf16>
    %cst = arith.constant dense<0.000000e+00> : vector<32x256xf32>
    %3 = tpu.matmul %2, %1, %cst {dimension_numbers = #tpu.dot_dimension_numbers<[1], [0], [0], [1], [0, 0, 1, 1], [], []>} : vector<32x16xbf16>, vector<16x256xbf16>, vector<32x256xf32> -> vector<32x256xf32>
    %c0_5 = arith.constant 0 : index
    %c0_6 = arith.constant 0 : index
    %4 = vector.load %arg5[%c0_5, %c0_6] : memref<32x1xf32, #tpu.memory_space<vmem>>, vector<32x1xf32>
    %5 = vector.broadcast %4 : vector<32x1xf32> to vector<32x256xf32>
    %6 = arith.addf %3, %5 : vector<32x256xf32>
    %cst_7 = arith.constant 0.000000e+00 : f32
    %7 = vector.broadcast %cst_7 : f32 to vector<32x256xf32>
    %8 = arith.maximumf %6, %7 : vector<32x256xf32>
    %c0_8 = arith.constant 0 : index
    %c0_9 = arith.constant 0 : index
    %9 = vector.load %arg6[%c0_8, %c0_9] : memref<16x32xbf16, #tpu.memory_space<vmem>>, vector<16x32xbf16>
    %10 = arith.truncf %8 : vector<32x256xf32> to vector<32x256xbf16>
    %cst_10 = arith.constant dense<0.000000e+00> : vector<16x256xf32>
    %11 = tpu.matmul %9, %10, %cst_10 {dimension_numbers = #tpu.dot_dimension_numbers<[1], [0], [0], [1], [0, 0, 1, 1], [], []>} : vector<16x32xbf16>, vector<32x256xbf16>, vector<16x256xf32> -> vector<16x256xf32>
    %c0_11 = arith.constant 0 : index
    %c0_12 = arith.constant 0 : index
    %12 = vector.load %arg7[%c0_11, %c0_12] : memref<16x1xf32, #tpu.memory_space<vmem>>, vector<16x1xf32>
    %13 = vector.broadcast %12 : vector<16x1xf32> to vector<16x256xf32>
    %14 = arith.addf %11, %13 : vector<16x256xf32>
    %c0_13 = arith.constant 0 : index
    %c0_14 = arith.constant 0 : index
    %15 = vector.load %arg3[%c0_13, %c0_14] : memref<16x256xbf16, #tpu.memory_space<vmem>>, vector<16x256xbf16>
    %16 = arith.extf %15 : vector<16x256xbf16> to vector<16x256xf32>
    %17 = vector.broadcast %0 : f32 to vector<16x256xf32>
    %18 = arith.mulf %17, %16 : vector<16x256xf32>
    %19 = arith.addf %14, %18 : vector<16x256xf32>
    %c0_15 = arith.constant 0 : index
    %c0_16 = arith.constant 0 : index
    %20 = vector.load %arg8[%c0_15, %c0_16] : memref<32x16xbf16, #tpu.memory_space<vmem>>, vector<32x16xbf16>
    %21 = arith.truncf %19 : vector<16x256xf32> to vector<16x256xbf16>
    %cst_17 = arith.constant dense<0.000000e+00> : vector<32x256xf32>
    %22 = tpu.matmul %20, %21, %cst_17 {dimension_numbers = #tpu.dot_dimension_numbers<[1], [0], [0], [1], [0, 0, 1, 1], [], []>} : vector<32x16xbf16>, vector<16x256xbf16>, vector<32x256xf32> -> vector<32x256xf32>
    %c0_18 = arith.constant 0 : index
    %c0_19 = arith.constant 0 : index
    %23 = vector.load %arg9[%c0_18, %c0_19] : memref<32x1xf32, #tpu.memory_space<vmem>>, vector<32x1xf32>
    %24 = vector.broadcast %23 : vector<32x1xf32> to vector<32x256xf32>
    %25 = arith.addf %22, %24 : vector<32x256xf32>
    %cst_20 = arith.constant 0.000000e+00 : f32
    %26 = vector.broadcast %cst_20 : f32 to vector<32x256xf32>
    %27 = arith.maximumf %25, %26 : vector<32x256xf32>
    %c0_21 = arith.constant 0 : index
    %c0_22 = arith.constant 0 : index
    %28 = vector.load %arg10[%c0_21, %c0_22] : memref<16x32xbf16, #tpu.memory_space<vmem>>, vector<16x32xbf16>
    %29 = arith.truncf %27 : vector<32x256xf32> to vector<32x256xbf16>
    %cst_23 = arith.constant dense<0.000000e+00> : vector<16x256xf32>
    %30 = tpu.matmul %28, %29, %cst_23 {dimension_numbers = #tpu.dot_dimension_numbers<[1], [0], [0], [1], [0, 0, 1, 1], [], []>} : vector<16x32xbf16>, vector<32x256xbf16>, vector<16x256xf32> -> vector<16x256xf32>
    %c0_24 = arith.constant 0 : index
    %c0_25 = arith.constant 0 : index
    %31 = vector.load %arg11[%c0_24, %c0_25] : memref<16x1xf32, #tpu.memory_space<vmem>>, vector<16x1xf32>
    %32 = vector.broadcast %31 : vector<16x1xf32> to vector<16x256xf32>
    %33 = arith.addf %30, %32 : vector<16x256xf32>
    %34 = arith.truncf %14 : vector<16x256xf32> to vector<16x256xbf16>
    %c0_26 = arith.constant 0 : index
    %c0_27 = arith.constant 0 : index
    %35 = vector.load %arg13[%c0_26, %c0_27] : memref<16x256xbf16, #tpu.memory_space<vmem>>, vector<16x256xbf16>
    tpu.vector_store %arg13[%c0_26, %c0_27], %34 {strides = array<i32>} : memref<16x256xbf16, #tpu.memory_space<vmem>>, vector<16x256xbf16>,
    %36 = arith.truncf %33 : vector<16x256xf32> to vector<16x256xbf16>
    %c0_28 = arith.constant 0 : index
    %c0_29 = arith.constant 0 : index
    %37 = vector.load %arg12[%c0_28, %c0_29] : memref<16x256xbf16, #tpu.memory_space<vmem>>, vector<16x256xbf16>
    tpu.vector_store %arg12[%c0_28, %c0_29], %36 {strides = array<i32>} : memref<16x256xbf16, #tpu.memory_space<vmem>>, vector<16x256xbf16>,
    return
  }
  func.func @transform_0(%arg0: i32) -> (i32, i32) {
    %c0_i32 = arith.constant 0 : i32
    %c0_i32_0 = arith.constant 0 : i32
    %c0_i32_1 = arith.constant 0 : i32
    return %c0_i32, %c0_i32_0 : i32, i32
  }
  func.func @transform_1(%arg0: i32) -> (i32, i32) {
    %c0_i32 = arith.constant 0 : i32
    %c0_i32_0 = arith.constant 0 : i32
    return %c0_i32, %arg0 : i32, i32
  }
  func.func @transform_2(%arg0: i32) -> (i32, i32) {
    %c0_i32 = arith.constant 0 : i32
    %c0_i32_0 = arith.constant 0 : i32
    return %c0_i32, %arg0 : i32, i32
  }
  func.func @transform_3(%arg0: i32) -> (i32, i32) {
    %c0_i32 = arith.constant 0 : i32
    %c0_i32_0 = arith.constant 0 : i32
    %c0_i32_1 = arith.constant 0 : i32
    return %c0_i32, %c0_i32_0 : i32, i32
  }
  func.func @transform_4(%arg0: i32) -> (i32, i32) {
    %c0_i32 = arith.constant 0 : i32
    %c0_i32_0 = arith.constant 0 : i32
    %c0_i32_1 = arith.constant 0 : i32
    return %c0_i32, %c0_i32_0 : i32, i32
  }
  func.func @transform_5(%arg0: i32) -> (i32, i32) {
    %c0_i32 = arith.constant 0 : i32
    %c0_i32_0 = arith.constant 0 : i32
    %c0_i32_1 = arith.constant 0 : i32
    return %c0_i32, %c0_i32_0 : i32, i32
  }
  func.func @transform_6(%arg0: i32) -> (i32, i32) {
    %c0_i32 = arith.constant 0 : i32
    %c0_i32_0 = arith.constant 0 : i32
    %c0_i32_1 = arith.constant 0 : i32
    return %c0_i32, %c0_i32_0 : i32, i32
  }
  func.func @transform_7(%arg0: i32) -> (i32, i32) {
    %c0_i32 = arith.constant 0 : i32
    %c0_i32_0 = arith.constant 0 : i32
    %c0_i32_1 = arith.constant 0 : i32
    return %c0_i32, %c0_i32_0 : i32, i32
  }
  func.func @transform_8(%arg0: i32) -> (i32, i32) {
    %c0_i32 = arith.constant 0 : i32
    %c0_i32_0 = arith.constant 0 : i32
    %c0_i32_1 = arith.constant 0 : i32
    return %c0_i32, %c0_i32_0 : i32, i32
  }
  func.func @transform_9(%arg0: i32) -> (i32, i32) {
    %c0_i32 = arith.constant 0 : i32
    %c0_i32_0 = arith.constant 0 : i32
    %c0_i32_1 = arith.constant 0 : i32
    return %c0_i32, %c0_i32_0 : i32, i32
  }
  func.func @transform_10(%arg0: i32) -> (i32, i32) {
    %c0_i32 = arith.constant 0 : i32
    %c0_i32_0 = arith.constant 0 : i32
    %c0_i32_1 = arith.constant 0 : i32
    return %c0_i32, %c0_i32_0 : i32, i32
  }
  func.func @transform_11(%arg0: i32) -> (i32, i32) {
    %c0_i32 = arith.constant 0 : i32
    %c0_i32_0 = arith.constant 0 : i32
    return %c0_i32, %arg0 : i32, i32
  }
  func.func @transform_12(%arg0: i32) -> (i32, i32) {
    %c0_i32 = arith.constant 0 : i32
    %c0_i32_0 = arith.constant 0 : i32
    return %c0_i32, %arg0 : i32, i32
  }
}

</mosaic_0001>

<bundles_post_ra>
// kernel: tpu_custom_call.1
= control target key start
LH: loop header
LB: loop body
LE: loop exit
PB: predicated region body
PF: predicated region fallthrough
CT: control target
= control target key end

     0   :  { %19 = vsyncpa [#allocation4], 0  ;;  %v570_v2 = vmov 0   ;;  %vm95_vm0 = vcmask 130048   ;;  %s753_s0 = inlined_call_operand.<no memory space> [shape: f32[1,1], index: 0, kind: input, shape index: {}]   ;;  %s754_s1 = inlined_call_operand.vmem [shape: bf16[16,256], index: 1, kind: input, shape index: {}]   ;;  %s755_s2 = inlined_call_operand.vmem [shape: bf16[16,256], index: 2, kind: input, shape index: {}]   ;;  %s756_s3 = inlined_call_operand.vmem [shape: bf16[32,16], index: 3, kind: input, shape index: {}]   ;;  %s757_s4 = inlined_call_operand.vmem [shape: f32[32,1], index: 4, kind: input, shape index: {}]   ;;  %s758_s5 = inlined_call_operand.vmem [shape: bf16[16,32], index: 5, kind: input, shape index: {}]   ;;  %s759_s6 = inlined_call_operand.vmem [shape: f32[16,1], index: 6, kind: input, shape index: {}]   ;;  %s760_s7 = inlined_call_operand.vmem [shape: bf16[32,16], index: 7, kind: input, shape index: {}]   ;;  %s761_s8 = inlined_call_operand.vmem [shape: f32[32,1], index: 8, kind: input, shape index: {}]   ;;  %s762_s9 = inlined_call_operand.vmem [shape: bf16[16,32], index: 9, kind: input, shape index: {}]   ;;  %s763_s10 = inlined_call_operand.vmem [shape: f32[16,1], index: 10, kind: input, shape index: {}]   ;;  %s764_s11 = inlined_call_operand.hbm [shape: bf16[16,256], index: 11, kind: output, shape index: {0}]   ;;  %s765_s12 = inlined_call_operand.hbm [shape: bf16[16,256], index: 12, kind: output, shape index: {1}]  }
   0x1   :  { %v513_v0 = vld [vmem:[%s754_s1 + $0x4] ss:$8 sps:$4 sm:$0xff]   ;;  %v515_v1 = vld [vmem:[%s754_s1] ss:$8 sps:$4 sm:$0xff]   ;;  %134 = vmatprep.mubr.bf16.mxu0 %v570_v2  ;;  %511 = vset.pattern.permute.xlu0 %v570_v2  ;;  %v53_v5 = vld [vmem:[%s757_s4 + $0x10] sm:$0xff] }
   0x2   :  { %102 = vmatprep.subr.bf16.mxu0 %v513_v0  ;;  %v516_v3 = vld [vmem:[%s756_s3] sm:$0xff]   ;;  %512 = vset.pattern.permute.xlu1 %v570_v2  ;;  %v52_v6 = vld [vmem:[%s757_s4 + $0x8] sm:$0xff]  ;;  %v54_v7 = vld [vmem:[%s757_s4 + $0x18] sm:$0xff] }
   0x3   :  { %103 = vmatpush1.bf16.msra.mxu0 %v515_v1  ;;  %v51_v4 = vld [vmem:[%s757_s4] sm:$0xff]  ;;  %222 = vmatprep.mubr.bf16.mxu1 %v570_v2  ;;  %v170_v9 = vld [vmem:[%s759_s6 + $0x8] sm:$0xff] }
   0x4   :  { %57 = vperm.xlu0 %511, %v51_v4   ;;  %67 = vperm.xlu1 %512, %v53_v5   ;;  %v169_v8 = vld [vmem:[%s759_s6] sm:$0xff]  ;;  %v517_v10 = vld [vmem:[%s756_s3 + $0x8] sm:$0xff]  }
   0x6   :  { %488 = vmatmul.mubr.msk.bf16.vlgmr.msra.gmra.mrb[0].mxu0 %vm95_vm0, %v516_v3 }
   0x7   :  { %144 = vmatprep.mubr.bf16.mxu0 %v570_v2 }
   0x8   :  { %62 = vperm.xlu0 %511, %v52_v6   ;;  %72 = vperm.xlu1 %512, %v54_v7  }
   0x9   :  { %20 = vsyncpa [#allocation6], 0  ;;  %v254_v11 = vld [vmem:[%s761_s8] sm:$0xff]  ;;  %v255_v12 = vld [vmem:[%s761_s8 + $0x8] sm:$0xff]  ;;  %vm186_vm1 = vcmask 261120   ;;  %v239_v54 = vstv %s753_s0  ;;  %s571_s20 = smov [#allocation5]  }
   0xa   :  { %v256_v13 = vld [vmem:[%s761_s8 + $0x10] sm:$0xff]  ;;  %v257_v14 = vld [vmem:[%s761_s8 + $0x18] sm:$0xff]  ;;  %v361_v15 = vld [vmem:[%s763_s10] sm:$0xff]  ;;  %s469_s21 = sshll.u32 %s571_s20, 4  ;;  %s470_s21 = int_to_ptr.vmem [resolvable:$true] %s469_s21 }
   0xb   :  { %v362_v16 = vld [vmem:[%s763_s10 + $0x8] sm:$0xff]  ;;  %v518_v49 = vld [vmem:[%s758_s5] sm:$0xff]   ;;  %s522_s4 = scalar_lea.vmem %s470_s21, 256  ;;  %p527_p1 = scmp.lt.s32.totalorder %s470_s21, %s470_s21 }
   0xc   :  { %173 = vperm.xlu0 %511, %v169_v8   ;;  %178 = vperm.xlu1 %512, %v170_v9   ;;  %v233_v50 = vld [vmem:[%s755_s2] sm:$0xff]  ;;  %v234_v51 = vld [vmem:[%s755_s2 + $0x8] sm:$0xff]  ;;  %p523_p0 = scmp.ne.s32.totalorder %s470_s21, %s522_s4  ;;  %p528_p2 = scmp.lt.s32.totalorder %s522_s4, %s522_s4 }
   0xd   :  { %v235_v52 = vunpack.c.l.bf16 %v233_v50  ;;  %v237_v53 = vunpack.c.l.bf16 %v234_v51  ;;  %v236_v55 = vunpack.c.h.bf16 %v233_v50  ;;  %v238_v56 = vunpack.c.h.bf16 %v234_v51 }
   0xe   :  { %489 = vmatmul.mubr.msk.bf16.gmra.mrb[4].mxu0 %vm95_vm0, %v517_v10  ;;  %p529_p3 = por %p528_p2, %p527_p1 }
   0xf   :  { %413 = vmatprep.mubr.bf16.mxu0 %v570_v2  ;;  %v240_v60 = vmul.f32 %v239_v54, %v235_v52  ;;  %v242_v62 = vmul.f32 %v239_v54, %v237_v53  ;;  %v241_v1 = vmul.f32 %v239_v54, %v236_v55  ;;  %v243_v4 = vmul.f32 %v239_v54, %v238_v56 }
  0x10   :  { %260 = vperm.xlu0 %511, %v254_v11   ;;  %265 = vperm.xlu1 %512, %v255_v12   ;;  %p530_p4 = pnand %p529_p3, %p523_p0 }
  0x14   :  { %270 = vperm.xlu0 %511, %v256_v13   ;;  %275 = vperm.xlu1 %512, %v257_v14  }
  0x18   :  { %365 = vperm.xlu0 %511, %v361_v15   ;;  %370 = vperm.xlu1 %512, %v362_v16   ;;  %v519_v16 = vld [vmem:[%s760_s7] sm:$0xff]  }
  0x83   :  { %v58_v17 = vpop.permute.xlu0 %57  ;;  %v68_v26 = vpop.permute.xlu1 %67 }
  0x87   :  { %v63_v21 = vpop.permute.xlu0 %62  ;;  %v73_v37 = vpop.permute.xlu1 %72 }
  0x8b   :  { %v174_v57 = vpop.permute.xlu0 %173  ;;  %v179_v63 = vpop.permute.xlu1 %178 }
  0xd9   :  { %v136_v18 = vpop.f32.mrb[0].mxu0 }
  0xda   :  { %v137_v19 = vadd.f32 %v136_v18, %v58_v17  ;;  %v138_v20 = vpop.f32.mrb[1].mxu0  ;;  %v261_v18 = vpop.permute.xlu0 %260 }
  0xdb   :  { %v139_v22 = vadd.f32 %v138_v20, %v58_v17  ;;  %v140_v23 = vpop.f32.mrb[2].mxu0  ;;  %v520_v17 = vld [vmem:[%s760_s7 + $0x8] sm:$0xff]  }
  0xdc   :  { %v141_v24 = vadd.f32 %v140_v23, %v63_v21  ;;  %v142_v25 = vpop.f32.mrb[3].mxu0  ;;  %v155_v28 = vmax.f32 %v137_v19, 0.0 }
  0xdd   :  { %v143_v27 = vadd.f32 %v142_v25, %v63_v21  ;;  %v156_v30 = vmax.f32 %v139_v22, 0.0  ;;  %v266_v22 = vpop.permute.xlu1 %265 }
  0xde   :  { %v157_v29 = vmax.f32 %v141_v24, 0.0 }
  0xdf   :  { %v158_v31 = vmax.f32 %v143_v27, 0.0 }
  0xe0   :  { %v165_v32 = vpack.c.bf16 %v157_v29, %v155_v28 }
  0xe1   :  { %v146_v33 = vpop.f32.mrb[4].mxu0  ;;  %v166_v34 = vpack.c.bf16 %v158_v31, %v156_v30 }
  0xe2   :  { %v147_v35 = vadd.f32 %v146_v33, %v68_v26  ;;  %v148_v36 = vpop.f32.mrb[5].mxu0 }
  0xe3   :  { %v149_v38 = vadd.f32 %v148_v36, %v68_v26  ;;  %v150_v39 = vpop.f32.mrb[6].mxu0  ;;  %190 = vmatprep.subr.bf16.mxu1 %v166_v34 }
  0xe4   :  { %v151_v40 = vadd.f32 %v150_v39, %v73_v37  ;;  %v152_v41 = vpop.f32.mrb[7].mxu0  ;;  %191 = vmatpush1.bf16.msra.mxu1 %v165_v32  ;;  %v159_v43 = vmax.f32 %v147_v35, 0.0  ;;  %v271_v32 = vpop.permute.xlu0 %270 }
  0xe5   :  { %v153_v42 = vadd.f32 %v152_v41, %v73_v37  ;;  %v160_v45 = vmax.f32 %v149_v38, 0.0  ;;  %v276_v37 = vpop.permute.xlu1 %275 }
  0xe6   :  { %v161_v44 = vmax.f32 %v151_v40, 0.0 }
  0xe7   :  { %v162_v46 = vmax.f32 %v153_v42, 0.0 }
  0xe8   :  { %v167_v47 = vpack.c.bf16 %v161_v44, %v159_v43 }
  0xe9   :  { %v168_v48 = vpack.c.bf16 %v162_v46, %v160_v45 }
  0xeb   :  { %192 = vmatprep.subr.bf16.mxu1 %v168_v48 }
  0xec   :  { %193 = vmatpush1.bf16.msra.mxu1 %v167_v47 }
  0xef   :  { %491 = vmatmul.mubr.msk.bf16.vlgmr.msra.gmra.mrb[0].mxu1 %vm186_vm1, %v518_v49  ;;  %v521_v49 = vld [vmem:[%s762_s9] sm:$0xff]  }
  0xf0   :  { %326 = vmatprep.mubr.bf16.mxu1 %v570_v2 }
 0x1c2   :  { %v224_v58 = vpop.f32.mrb[0].mxu1 }
 0x1c3   :  { %v225_v59 = vadd.f32 %v224_v58, %v174_v57  ;;  %v226_v61 = vpop.f32.mrb[1].mxu1 }
 0x1c4   :  { %v227_v0 = vadd.f32 %v226_v61, %v174_v57  ;;  %v228_v3 = vpop.f32.mrb[2].mxu1 }
 0x1c5   :  { %v229_v5 = vadd.f32 %v228_v3, %v179_v63  ;;  %v230_v6 = vpop.f32.mrb[3].mxu1  ;;  %v244_v9 = vadd.f32 %v240_v60, %v225_v59 }
 0x1c6   :  { %v502_v7 = vpack.c.bf16 %v227_v0, %v225_v59  ;;  %v231_v8 = vadd.f32 %v230_v6, %v179_v63  ;;  %v245_v11 = vadd.f32 %v241_v1, %v227_v0 }
 0x1c7   :  { %v246_v10 = vadd.f32 %v242_v62, %v229_v5 }
 0x1c8   :  { %436 = vst [vmem:[#allocation5] sm:$0xff] %v502_v7  ;;  %v247_v12 = vadd.f32 %v243_v4, %v231_v8  ;;  %v503_v13 = vpack.c.bf16 %v231_v8, %v229_v5 }
 0x1c9   :  { %v252_v14 = vpack.c.bf16 %v246_v10, %v244_v9 }
 0x1ca   :  { %437 = vst [vmem:[#allocation5 + $0x8] sm:$0xff] %v503_v13  ;;  %v253_v15 = vpack.c.bf16 %v247_v12, %v245_v11 }
 0x1cc   :  { %294 = vmatprep.subr.bf16.mxu1 %v253_v15 }
 0x1cd   :  { %295 = vmatpush1.bf16.msra.mxu1 %v252_v14 }
 0x1d0   :  { %494 = vmatmul.mubr.msk.bf16.vlgmr.msra.gmra.mrb[4].mxu1 %vm95_vm0, %v519_v16 }
 0x1d1   :  { %336 = vmatprep.mubr.bf16.mxu1 %v570_v2 }
 0x1d8   :  { %495 = vmatmul.mubr.msk.bf16.gmra.mrb[8].mxu1 %vm95_vm0, %v520_v17 }
 0x2a3   :  { %v328_v19 = vpop.f32.mrb[4].mxu1 }
 0x2a4   :  { %v329_v20 = vadd.f32 %v328_v19, %v261_v18  ;;  %v330_v21 = vpop.f32.mrb[5].mxu1 }
 0x2a5   :  { %v331_v23 = vadd.f32 %v330_v21, %v261_v18  ;;  %v332_v24 = vpop.f32.mrb[6].mxu1 }
 0x2a6   :  { %v333_v25 = vadd.f32 %v332_v24, %v266_v22  ;;  %v334_v26 = vpop.f32.mrb[7].mxu1  ;;  %v347_v28 = vmax.f32 %v329_v20, 0.0 }
 0x2a7   :  { %v335_v27 = vadd.f32 %v334_v26, %v266_v22  ;;  %v348_v30 = vmax.f32 %v331_v23, 0.0 }
 0x2a8   :  { %v349_v29 = vmax.f32 %v333_v25, 0.0 }
 0x2a9   :  { %v350_v2 = vmax.f32 %v335_v27, 0.0 }
 0x2aa   :  { %v357_v31 = vpack.c.bf16 %v349_v29, %v347_v28 }
 0x2ab   :  { %v358_v33 = vpack.c.bf16 %v350_v2, %v348_v30  ;;  %v338_v34 = vpop.f32.mrb[8].mxu1 }
 0x2ac   :  { %v339_v35 = vadd.f32 %v338_v34, %v271_v32  ;;  %v340_v36 = vpop.f32.mrb[9].mxu1 }
 0x2ad   :  { %v341_v38 = vadd.f32 %v340_v36, %v271_v32  ;;  %v342_v39 = vpop.f32.mrb[10].mxu1  ;;  %381 = vmatprep.subr.bf16.mxu0 %v358_v33 }
 0x2ae   :  { %v343_v40 = vadd.f32 %v342_v39, %v276_v37  ;;  %v344_v41 = vpop.f32.mrb[11].mxu1  ;;  %382 = vmatpush1.bf16.msra.mxu0 %v357_v31  ;;  %v351_v43 = vmax.f32 %v339_v35, 0.0 }
 0x2af   :  { %v345_v42 = vadd.f32 %v344_v41, %v276_v37  ;;  %v352_v45 = vmax.f32 %v341_v38, 0.0 }
 0x2b0   :  { %v353_v44 = vmax.f32 %v343_v40, 0.0 }
 0x2b1   :  { %v354_v46 = vmax.f32 %v345_v42, 0.0 }
 0x2b2   :  { %v359_v47 = vpack.c.bf16 %v353_v44, %v351_v43 }
 0x2b3   :  { %v360_v48 = vpack.c.bf16 %v354_v46, %v352_v45 }
 0x2b5   :  { %383 = vmatprep.subr.bf16.mxu0 %v360_v48 }
 0x2b6   :  { %384 = vmatpush1.bf16.msra.mxu0 %v359_v47 }
 0x2b9   :  { %497 = vmatmul.mubr.msk.bf16.vlgmr.msra.gmra.mrb[8].mxu0 %vm186_vm1, %v521_v49 }
 0x2ba   :  { %533 = shalt.err (!%p530_p4)
}
 0x2bb   :  { %s534_s24 = scalar_lea.hbm %s765_s12, 256 }
 0x2bc   :  { %p535_p5 = scmp.ne.s32.totalorder %s765_s12, %s534_s24  ;;  %p538_p6 = scmp.lt.u32.totalorder %s534_s24, %s765_s12 }
 0x2be   :  { %p540_p7 = pnand %p538_p6, %p535_p5 }
 0x2c0   :  { %543 = shalt.err (!%p540_p7)
}
 0x2c1   :  { %s572_s26 = smov 128   ;;  %s573_s27 = smov 8   ;;  %v366_v50 = vpop.permute.xlu0 %365  ;;  %v371_v54 = vpop.permute.xlu1 %370 }
 0x2c2   :  { %475 = dma.vmem_to_hbm [thread:$0]  %s470_s21, 256, %s765_s12, [#allocation6], %s572_s26, %s572_s26, %s573_s27  }
 0x2c3   :  { %s574_s1 = smov [#allocation3]  }
 0x2c4   :  { %s457_s8 = sshll.u32 %s574_s1, 4  ;;  %s458_s8 = int_to_ptr.vmem [resolvable:$true] %s457_s8 }
 0x2c5   :  { %s544_s10 = scalar_lea.vmem %s458_s8, 256  ;;  %p549_p9 = scmp.lt.s32.totalorder %s458_s8, %s458_s8 }
 0x2c6   :  { %p545_p8 = scmp.ne.s32.totalorder %s458_s8, %s544_s10  ;;  %p550_p10 = scmp.lt.s32.totalorder %s544_s10, %s544_s10 }
 0x2c8   :  { %p551_p11 = por %p550_p10, %p549_p9 }
 0x2ca   :  { %p552_p12 = pnand %p551_p11, %p545_p8 }
 0x38c   :  { %v415_v51 = vpop.f32.mrb[8].mxu0 }
 0x38d   :  { %v416_v52 = vadd.f32 %v415_v51, %v366_v50  ;;  %v417_v53 = vpop.f32.mrb[9].mxu0 }
 0x38e   :  { %v418_v55 = vadd.f32 %v417_v53, %v366_v50  ;;  %v419_v56 = vpop.f32.mrb[10].mxu0 }
 0x38f   :  { %v420_v57 = vadd.f32 %v419_v56, %v371_v54  ;;  %v421_v58 = vpop.f32.mrb[11].mxu0 }
 0x390   :  { %v504_v59 = vpack.c.bf16 %v418_v55, %v416_v52  ;;  %v422_v60 = vadd.f32 %v421_v58, %v371_v54 }
 0x392   :  { %450 = vst [vmem:[#allocation3] sm:$0xff] %v504_v59  ;;  %v505_v61 = vpack.c.bf16 %v422_v60, %v420_v57 }
 0x394   :  { %451 = vst [vmem:[#allocation3 + $0x8] sm:$0xff] %v505_v61 }
 0x395   :  { %555 = shalt.err (!%p552_p12)
}
 0x396   :  { %s556_s13 = scalar_lea.hbm %s764_s11, 256 }
 0x397   :  { %p557_p13 = scmp.ne.s32.totalorder %s764_s11, %s556_s13  ;;  %p560_p0 = scmp.lt.u32.totalorder %s556_s13, %s764_s11 }
 0x399   :  { %p562_p1 = pnand %p560_p0, %p557_p13 }
 0x39b   :  { %565 = shalt.err (!%p562_p1)
}
 0x39c   :  { %463 = dma.vmem_to_hbm [thread:$0]  %s458_s8, 256, %s764_s11, [#allocation4], %s572_s26, %s572_s26, %s573_s27  }
 0x39d   :  { %566 = dma.done.wait [#allocation4], 256  }
 0x39e   :  { %567 = vsyncadd [#allocation4], 4294967040 }
 0x39f   :  { %568 = dma.done.wait [#allocation6], 256  }
 0x3a0   :  { %569 = vsyncadd [#allocation6], 4294967040 }
 0x3a1   :  { %482 = vsyncpa [#allocation4], 1 }
 0x3a2   :  { %483 = vsyncpa [#allocation6], 1 }

</bundles_post_ra>
